<compile_context>
chip_gen: v6e
topology: v6e:2x2x1
jax: 0.10.0
libtpu: 0.0.40
codegen_flags: <defaults>
</compile_context>

<pallas_src>
import math

import jax
import jax.numpy as jnp
from jax import lax
from jax.experimental import pallas as pl
from jax.experimental.pallas import tpu as pltpu


def mhsa_kernel(x_ref, wq_ref, wk_ref, wv_ref, wo_ref, o_ref, acc_ref):
    """One (batch, head) grid step: per-head projections, causal attention,
    and this head's contribution to the output projection (accumulated)."""
    h = pl.program_id(1)

    @pl.when(h == 0)
    def _():
        acc_ref[...] = jnp.zeros_like(acc_ref)

    x = x_ref[0]                                   # (S, D) bf16
    S = x.shape[0]

    # --- Per-head projections: plain (S,D)@(D,dk) matmuls, head handled by ---
    # --- the BlockSpec (no in-kernel slicing).  Scale folded into wq.      ---
    q = jnp.dot(x, wq_ref[0], preferred_element_type=jnp.float32)   # (S, dk)
    k = jnp.dot(x, wk_ref[0], preferred_element_type=jnp.float32)   # (S, dk)
    v = jnp.dot(x, wv_ref[0], preferred_element_type=jnp.float32)   # (S, dv)

    # --- Causal scores: q @ k^T without materializing a transpose. ----------
    s = lax.dot_general(q.astype(x.dtype), k.astype(x.dtype),
                        (((1,), (1,)), ((), ())),
                        preferred_element_type=jnp.float32)          # (S, S) f32

    row = lax.broadcasted_iota(jnp.int32, (S, S), 0)
    col = lax.broadcasted_iota(jnp.int32, (S, S), 1)
    # Finite sentinel, applied on the f32 scores (safe vs. bf16 saturation).
    s = jnp.where(col <= row, s, jnp.float32(-1e30))

    # --- Softmax with deferred normalization. -------------------------------
    m = jnp.max(s, axis=-1, keepdims=True)
    p = jnp.exp(s - m)                              # unnormalized probs (f32)
    l = jnp.sum(p, axis=-1, keepdims=True)          # row sums

    attn = jnp.dot(p.astype(x.dtype), v.astype(x.dtype),
                   preferred_element_type=jnp.float32)               # (S, dv)
    attn = attn * pl.reciprocal(l, approx=False)    # deferred normalization

    # --- This head's slice of the output projection, accumulated in f32. ----
    acc_ref[...] += jnp.dot(attn.astype(x.dtype), wo_ref[0],
                            preferred_element_type=jnp.float32)      # (S, D)

    @pl.when(h == pl.num_programs(1) - 1)
    def _():
        o_ref[0] = acc_ref[...].astype(o_ref.dtype)


def _vmem_limit_bytes():
    """Scoped-VMEM budget derived from the actual part (not hard-coded):
    ~75% of physical, capped at 100 MiB  =>  ~96 MiB on v5e/v6e (128 MiB),
    ~48 MiB on v7x (64 MiB per TensorCore)."""
    try:
        cap = pltpu.get_tpu_info().vmem_capacity_bytes
    except Exception:
        cap = 64 * 1024 * 1024          # conservative fallback (v7x per-TC)
    return int(min((cap * 3) // 4, 100 * 1024 * 1024))


def multihead_self_attention(x, q_proj, k_proj, v_proj, output_proj,
                             *, param_dtype=jnp.bfloat16,
                             out_dtype=jnp.bfloat16):
    """x: (B, S, D); q/k_proj: (H, dk, D); v_proj: (H, dv, D);
    output_proj: (D, H*dv).  Returns (B, S, D) in `out_dtype`."""
    B, S, D = x.shape
    H, dk, _ = q_proj.shape
    dv = v_proj.shape[1]

    # Wrapper-side weight prep (once, free relative to the kernel):
    #  * fold 1/sqrt(dk) into the Q weights,
    #  * pre-transpose so the kernel does plain (M,K)@(K,N) dots,
    #  * keep the head axis leading so BlockSpec streams one head per step,
    #  * cast everything the MXU touches to bf16.
    scale = 1.0 / math.sqrt(dk)
    wq = jnp.transpose(q_proj * scale, (0, 2, 1)).astype(param_dtype)  # (H, D, dk)
    wk = jnp.transpose(k_proj, (0, 2, 1)).astype(param_dtype)          # (H, D, dk)
    wv = jnp.transpose(v_proj, (0, 2, 1)).astype(param_dtype)          # (H, D, dv)
    wo = output_proj.T.reshape(H, dv, D).astype(param_dtype)           # (H, dv, D)
    xb = x.astype(param_dtype)

    return pl.pallas_call(
        mhsa_kernel,
        out_shape=jax.ShapeDtypeStruct((B, S, D), out_dtype),
        grid_spec=pltpu.PrefetchScalarGridSpec(
            num_scalar_prefetch=0,
            grid=(B, H),                          # head axis last = reduction
            in_specs=[
                pl.BlockSpec((1, S, D), lambda b, h: (b, 0, 0)),   # x (per batch; re-DMA skipped across h)
                pl.BlockSpec((1, D, dk), lambda b, h: (h, 0, 0)),  # Wq head h (scale folded)
                pl.BlockSpec((1, D, dk), lambda b, h: (h, 0, 0)),  # Wk head h
                pl.BlockSpec((1, D, dv), lambda b, h: (h, 0, 0)),  # Wv head h
                pl.BlockSpec((1, dv, D), lambda b, h: (h, 0, 0)),  # Wo head h
            ],
            out_specs=pl.BlockSpec((1, S, D), lambda b, h: (b, 0, 0)),
            scratch_shapes=[pltpu.VMEM((S, D), jnp.float32)],      # head-sum accumulator
        ),
        compiler_params=pltpu.CompilerParams(
            dimension_semantics=("parallel", "arbitrary"),
            vmem_limit_bytes=_vmem_limit_bytes()),
    )(xb, wq, wk, wv, wo)


def reference_mhsa(x, q_proj, k_proj, v_proj, output_proj,
                   *, param_dtype=jnp.float32):
    """Pure-JAX reference matching the PyTorch forward.  With
    param_dtype=bfloat16 it mirrors the kernel's mixed-precision policy
    (bf16 MXU operands, f32 accumulation / softmax), so the comparison isolates
    kernel-logic errors from rounding."""
    B, S, D = x.shape
    H, dk, _ = q_proj.shape
    dv = v_proj.shape[1]
    c = lambda a: a.astype(param_dtype)
    scale = 1.0 / math.sqrt(dk)
    xb = c(x)
    q = jnp.einsum('bsd,hkd->bhsk', xb, c(q_proj * scale),
                   preferred_element_type=jnp.float32)
    k = jnp.einsum('bsd,hkd->bhsk', xb, c(k_proj),
                   preferred_element_type=jnp.float32)
    v = jnp.einsum('bsd,hvd->bhsv', xb, c(v_proj),
                   preferred_element_type=jnp.float32)
    mask = jnp.triu(jnp.ones((S, S), dtype=bool), k=1)
    s = jnp.einsum('bhqk,bhsk->bhqs', c(q), c(k),
                   preferred_element_type=jnp.float32)
    s = jnp.where(mask, -jnp.inf, s)
    p = jax.nn.softmax(s, axis=-1)
    attn = jnp.einsum('bhqs,bhsv->bhqv', c(p), c(v),
                      preferred_element_type=jnp.float32)
    attn = attn.transpose(0, 2, 1, 3).reshape(B, S, H * dv)
    return jnp.einsum('bsf,df->bsd', c(attn), c(output_proj),
                      preferred_element_type=jnp.float32)


if __name__ == "__main__":
    # Small shapes consistent with the module's forward.
    B, S, d_model, num_heads = 2, 8, 32, 4
    d_key = d_model // num_heads
    d_value = d_model // num_heads

    key = jax.random.PRNGKey(0)
    kx, kq, kk, kv, ko = jax.random.split(key, 5)
    x = jax.random.normal(kx, (B, S, d_model), dtype=jnp.float32)
    q_proj = jax.random.normal(kq, (num_heads, d_key, d_model), dtype=jnp.float32)
    k_proj = jax.random.normal(kk, (num_heads, d_key, d_model), dtype=jnp.float32)
    v_proj = jax.random.normal(kv, (num_heads, d_value, d_model), dtype=jnp.float32)
    output_proj = jax.random.normal(ko, (d_model, num_heads * d_value),
                                    dtype=jnp.float32)

    out = multihead_self_attention(x, q_proj, k_proj, v_proj, output_proj)
    out = jax.block_until_ready(out)
    assert out.shape == (B, S, d_model)

    # Compare against a reference using the same mixed-precision policy as the
    # kernel (bf16 MXU operands, f32 accumulation / softmax); residual
    # differences come only from summation order and the bf16 output cast.
    ref = reference_mhsa(x, q_proj, k_proj, v_proj, output_proj,
                         param_dtype=jnp.bfloat16)
    out_f32 = out.astype(jnp.float32)
    rel_err = jnp.linalg.norm(out_f32 - ref) / jnp.linalg.norm(ref)
    assert rel_err < 2e-2, f"relative error too large: {rel_err}"

    print("KERNEL_OK")
</pallas_src>

<mosaic_0001>
module attributes {stable_mosaic.version = 11 : i64} {
  func.func @mhsa_kernel(%arg0: i32, %arg1: i32, %arg2: memref<1x8x32xbf16, #tpu.memory_space<vmem>>, %arg3: memref<1x32x8xbf16, #tpu.memory_space<vmem>>, %arg4: memref<1x32x8xbf16, #tpu.memory_space<vmem>>, %arg5: memref<1x32x8xbf16, #tpu.memory_space<vmem>>, %arg6: memref<1x8x32xbf16, #tpu.memory_space<vmem>>, %arg7: memref<1x8x32xbf16, #tpu.memory_space<vmem>>, %arg8: memref<8x32xf32, #tpu.memory_space<vmem>>) attributes {dimension_semantics = [#tpu.dimension_semantics<parallel>, #tpu.dimension_semantics<arbitrary>], iteration_bounds = array<i64: 2, 4>, scalar_prefetch = 0 : i64, scratch_operands = 1 : i64, tpu.core_type = #tpu.core_type<tc>, window_params = [{transform_indices = @transform_0, window_bounds = array<i64: 1, 8, 32>}, {transform_indices = @transform_1, window_bounds = array<i64: 1, 32, 8>}, {transform_indices = @transform_2, window_bounds = array<i64: 1, 32, 8>}, {transform_indices = @transform_3, window_bounds = array<i64: 1, 32, 8>}, {transform_indices = @transform_4, window_bounds = array<i64: 1, 8, 32>}, {transform_indices = @transform_5, window_bounds = array<i64: 1, 8, 32>}]} {
    %c0_i32 = arith.constant 0 : i32
    %0 = arith.cmpi eq, %arg1, %c0_i32 : i32
    %1 = arith.extui %0 : i1 to i32
    %c0_i32_0 = arith.constant 0 : i32
    %2 = arith.cmpi ne, %1, %c0_i32_0 : i32
    scf.if %2 {
      %cst_28 = arith.constant 0.000000e+00 : f32
      %45 = vector.broadcast %cst_28 : f32 to vector<8x32xf32>
      %c0_29 = arith.constant 0 : index
      %c0_30 = arith.constant 0 : index
      %46 = vector.load %arg8[%c0_29, %c0_30] : memref<8x32xf32, #tpu.memory_space<vmem>>, vector<8x32xf32>
      tpu.vector_store %arg8[%c0_29, %c0_30], %45 {strides = array<i32>} : memref<8x32xf32, #tpu.memory_space<vmem>>, vector<8x32xf32>,
    } else {
    }
    %c0 = arith.constant 0 : index
    %c0_1 = arith.constant 0 : index
    %c0_2 = arith.constant 0 : index
    %3 = vector.load %arg2[%c0, %c0_1, %c0_2] : memref<1x8x32xbf16, #tpu.memory_space<vmem>>, vector<1x8x32xbf16>
    %4 = vector.shape_cast %3 : vector<1x8x32xbf16> to vector<8x32xbf16>
    %c0_3 = arith.constant 0 : index
    %c0_4 = arith.constant 0 : index
    %c0_5 = arith.constant 0 : index
    %5 = vector.load %arg3[%c0_3, %c0_4, %c0_5] : memref<1x32x8xbf16, #tpu.memory_space<vmem>>, vector<1x32x8xbf16>
    %6 = vector.shape_cast %5 : vector<1x32x8xbf16> to vector<32x8xbf16>
    %cst = arith.constant dense<0.000000e+00> : vector<8x8xf32>
    %7 = tpu.matmul %4, %6, %cst {dimension_numbers = #tpu.dot_dimension_numbers<[1], [0], [0], [1], [0, 0, 1, 1], [], []>} : vector<8x32xbf16>, vector<32x8xbf16>, vector<8x8xf32> -> vector<8x8xf32>
    %c0_6 = arith.constant 0 : index
    %c0_7 = arith.constant 0 : index
    %c0_8 = arith.constant 0 : index
    %8 = vector.load %arg4[%c0_6, %c0_7, %c0_8] : memref<1x32x8xbf16, #tpu.memory_space<vmem>>, vector<1x32x8xbf16>
    %9 = vector.shape_cast %8 : vector<1x32x8xbf16> to vector<32x8xbf16>
    %cst_9 = arith.constant dense<0.000000e+00> : vector<8x8xf32>
    %10 = tpu.matmul %4, %9, %cst_9 {dimension_numbers = #tpu.dot_dimension_numbers<[1], [0], [0], [1], [0, 0, 1, 1], [], []>} : vector<8x32xbf16>, vector<32x8xbf16>, vector<8x8xf32> -> vector<8x8xf32>
    %c0_10 = arith.constant 0 : index
    %c0_11 = arith.constant 0 : index
    %c0_12 = arith.constant 0 : index
    %11 = vector.load %arg5[%c0_10, %c0_11, %c0_12] : memref<1x32x8xbf16, #tpu.memory_space<vmem>>, vector<1x32x8xbf16>
    %12 = vector.shape_cast %11 : vector<1x32x8xbf16> to vector<32x8xbf16>
    %cst_13 = arith.constant dense<0.000000e+00> : vector<8x8xf32>
    %13 = tpu.matmul %4, %12, %cst_13 {dimension_numbers = #tpu.dot_dimension_numbers<[1], [0], [0], [1], [0, 0, 1, 1], [], []>} : vector<8x32xbf16>, vector<32x8xbf16>, vector<8x8xf32> -> vector<8x8xf32>
    %14 = arith.truncf %7 : vector<8x8xf32> to vector<8x8xbf16>
    %15 = arith.truncf %10 : vector<8x8xf32> to vector<8x8xbf16>
    %cst_14 = arith.constant dense<0.000000e+00> : vector<8x8xf32>
    %16 = tpu.matmul %14, %15, %cst_14 {dimension_numbers = #tpu.dot_dimension_numbers<[1], [1], [0], [0], [0, 0, 1, 0], [], []>} : vector<8x8xbf16>, vector<8x8xbf16>, vector<8x8xf32> -> vector<8x8xf32>
    %17 = tpu.iota {dimensions = array<i32: 0>} : vector<8x8xi32>
    %18 = tpu.iota {dimensions = array<i32: 1>} : vector<8x8xi32>
    %19 = arith.cmpi sle, %18, %17 : vector<8x8xi32>
    %cst_15 = arith.constant -1.000000e+30 : f32
    %20 = vector.broadcast %cst_15 : f32 to vector<8x8xf32>
    %21 = arith.select %19, %16, %20 : vector<8x8xi1>, vector<8x8xf32>
    %cst_16 = arith.constant dense<0xFF800000> : vector<8xf32>
    %22 = vector.multi_reduction <maximumf>, %21, %cst_16 [1] : vector<8x8xf32> to vector<8xf32>
    %23 = vector.shape_cast %22 : vector<8xf32> to vector<8x1xf32>
    %24 = vector.broadcast %23 : vector<8x1xf32> to vector<8x8xf32>
    %25 = arith.subf %21, %24 : vector<8x8xf32>
    %26 = math.exp %25 : vector<8x8xf32>
    %cst_17 = arith.constant dense<0.000000e+00> : vector<8xf32>
    %27 = vector.multi_reduction <add>, %26, %cst_17 [1] : vector<8x8xf32> to vector<8xf32>
    %28 = vector.shape_cast %27 : vector<8xf32> to vector<8x1xf32>
    %29 = arith.truncf %26 : vector<8x8xf32> to vector<8x8xbf16>
    %30 = arith.truncf %13 : vector<8x8xf32> to vector<8x8xbf16>
    %cst_18 = arith.constant dense<0.000000e+00> : vector<8x8xf32>
    %31 = tpu.matmul %29, %30, %cst_18 {dimension_numbers = #tpu.dot_dimension_numbers<[1], [0], [0], [1], [0, 0, 1, 1], [], []>} : vector<8x8xbf16>, vector<8x8xbf16>, vector<8x8xf32> -> vector<8x8xf32>
    %32 = tpu.reciprocal %28 : vector<8x1xf32> -> vector<8x1xf32>
    %33 = vector.broadcast %32 : vector<8x1xf32> to vector<8x8xf32>
    %34 = arith.mulf %31, %33 : vector<8x8xf32>
    %c0_19 = arith.constant 0 : index
    %c0_20 = arith.constant 0 : index
    %35 = vector.load %arg8[%c0_19, %c0_20] : memref<8x32xf32, #tpu.memory_space<vmem>>, vector<8x32xf32>
    %36 = arith.truncf %34 : vector<8x8xf32> to vector<8x8xbf16>
    %c0_21 = arith.constant 0 : index
    %c0_22 = arith.constant 0 : index
    %c0_23 = arith.constant 0 : index
    %37 = vector.load %arg6[%c0_21, %c0_22, %c0_23] : memref<1x8x32xbf16, #tpu.memory_space<vmem>>, vector<1x8x32xbf16>
    %38 = vector.shape_cast %37 : vector<1x8x32xbf16> to vector<8x32xbf16>
    %cst_24 = arith.constant dense<0.000000e+00> : vector<8x32xf32>
    %39 = tpu.matmul %36, %38, %cst_24 {dimension_numbers = #tpu.dot_dimension_numbers<[1], [0], [0], [1], [0, 0, 1, 1], [], []>} : vector<8x8xbf16>, vector<8x32xbf16>, vector<8x32xf32> -> vector<8x32xf32>
    %40 = arith.addf %35, %39 : vector<8x32xf32>
    %c0_25 = arith.constant 0 : index
    %c0_26 = arith.constant 0 : index
    %41 = vector.load %arg8[%c0_25, %c0_26] : memref<8x32xf32, #tpu.memory_space<vmem>>, vector<8x32xf32>
    tpu.vector_store %arg8[%c0_25, %c0_26], %40 {strides = array<i32>} : memref<8x32xf32, #tpu.memory_space<vmem>>, vector<8x32xf32>,
    %c3_i32 = arith.constant 3 : i32
    %42 = arith.cmpi eq, %arg1, %c3_i32 : i32
    %43 = arith.extui %42 : i1 to i32
    %c0_i32_27 = arith.constant 0 : i32
    %44 = arith.cmpi ne, %43, %c0_i32_27 : i32
    scf.if %44 {
      %c0_28 = arith.constant 0 : index
      %c0_29 = arith.constant 0 : index
      %45 = vector.load %arg8[%c0_28, %c0_29] : memref<8x32xf32, #tpu.memory_space<vmem>>, vector<8x32xf32>
      %46 = arith.truncf %45 : vector<8x32xf32> to vector<8x32xbf16>
      %c0_30 = arith.constant 0 : index
      %c0_31 = arith.constant 0 : index
      %c0_32 = arith.constant 0 : index
      %47 = vector.load %arg7[%c0_30, %c0_31, %c0_32] : memref<1x8x32xbf16, #tpu.memory_space<vmem>>, vector<1x8x32xbf16>
      %48 = vector.shape_cast %47 : vector<1x8x32xbf16> to vector<8x32xbf16>
      %49 = vector.shape_cast %46 : vector<8x32xbf16> to vector<1x8x32xbf16>
      tpu.vector_store %arg7[%c0_30, %c0_31, %c0_32], %49 {strides = array<i32>} : memref<1x8x32xbf16, #tpu.memory_space<vmem>>, vector<1x8x32xbf16>,
    } else {
    }
    return
  }
  func.func @transform_0(%arg0: i32, %arg1: i32) -> (i32, i32, i32) {
    %c0_i32 = arith.constant 0 : i32
    %c0_i32_0 = arith.constant 0 : i32
    %c0_i32_1 = arith.constant 0 : i32
    return %arg0, %c0_i32, %c0_i32_0 : i32, i32, i32
  }
  func.func @transform_1(%arg0: i32, %arg1: i32) -> (i32, i32, i32) {
    %c0_i32 = arith.constant 0 : i32
    %c0_i32_0 = arith.constant 0 : i32
    %c0_i32_1 = arith.constant 0 : i32
    return %arg1, %c0_i32, %c0_i32_0 : i32, i32, i32
  }
  func.func @transform_2(%arg0: i32, %arg1: i32) -> (i32, i32, i32) {
    %c0_i32 = arith.constant 0 : i32
    %c0_i32_0 = arith.constant 0 : i32
    %c0_i32_1 = arith.constant 0 : i32
    return %arg1, %c0_i32, %c0_i32_0 : i32, i32, i32
  }
  func.func @transform_3(%arg0: i32, %arg1: i32) -> (i32, i32, i32) {
    %c0_i32 = arith.constant 0 : i32
    %c0_i32_0 = arith.constant 0 : i32
    %c0_i32_1 = arith.constant 0 : i32
    return %arg1, %c0_i32, %c0_i32_0 : i32, i32, i32
  }
  func.func @transform_4(%arg0: i32, %arg1: i32) -> (i32, i32, i32) {
    %c0_i32 = arith.constant 0 : i32
    %c0_i32_0 = arith.constant 0 : i32
    %c0_i32_1 = arith.constant 0 : i32
    return %arg1, %c0_i32, %c0_i32_0 : i32, i32, i32
  }
  func.func @transform_5(%arg0: i32, %arg1: i32) -> (i32, i32, i32) {
    %c0_i32 = arith.constant 0 : i32
    %c0_i32_0 = arith.constant 0 : i32
    %c0_i32_1 = arith.constant 0 : i32
    return %arg0, %c0_i32, %c0_i32_0 : i32, i32, i32
  }
}

</mosaic_0001>

<bundles_post_ra>
// kernel: tpu_custom_call.1
= control target key start
LH: loop header
LB: loop body
LE: loop exit
PB: predicated region body
PF: predicated region fallthrough
CT: control target
= control target key end

     0   :  { %10 = vsyncpa [#allocation4], 0  ;;  %s1270_s0 = inlined_call_operand.vmem [shape: bf16[2,8,32], index: 0, kind: input, shape index: {}]   ;;  %s1271_s1 = inlined_call_operand.vmem [shape: bf16[4,32,8], index: 1, kind: input, shape index: {}]   ;;  %s1272_s2 = inlined_call_operand.vmem [shape: bf16[4,32,8], index: 2, kind: input, shape index: {}]   ;;  %s1273_s3 = inlined_call_operand.vmem [shape: bf16[4,32,8], index: 3, kind: input, shape index: {}]   ;;  %s1274_s4 = inlined_call_operand.vmem [shape: bf16[4,8,32], index: 4, kind: input, shape index: {}]   ;;  %s1275_s5 = inlined_call_operand.hbm [shape: bf16[2,8,32], index: 5, kind: output, shape index: {}]  }
   0x1   :  { %12 = vsyncpa [#allocation4 + $0x1], 0  ;;  %s1099_s18 = smov 0   ;;  %s1101_s19 = smov 0  }
   0x2   :  { %s1103_s20 = smov 0   ;;  %s1105_s21 = smov 0  }
   0x3   :  { %s1107_s22 = smov 0   ;;  %s1109_s23 = smov 0  }
   0x4   :  { %s1111_s24 = smov 0   ;;  %s1113_s25 = smov 0  }
   0x5 LB: > { %1282 = sst [smem:[#allocation6_spill]] %s1043_s20  ;;  %s795_s26 = sadd.s32 4294967295, %s1063_s25   ;;  %s1063_s25 = sphi %s1113_s25, %s18_s25   ;;  %s1059_s24 = sphi %s1111_s24, %s1298_s24   ;;  %s1055_s23 = sphi %s1109_s23, %s1297_s23   ;;  %s1051_s22 = sphi %s1107_s22, %s1296_s22   ;;  %s1047_s21 = sphi %s1105_s21, %s1295_s21   ;;  %s1043_s20 = sphi %s1103_s20, %s1294_s20   ;;  %s1039_s19 = sphi %s1101_s19, %s1300_s19   ;;  %s1035_s18 = sphi %s1099_s18, %s1299_s18  }
   0x6   : > { %1283 = sst [smem:[#allocation7_spill]] %s1055_s23  ;;  %s796_s27 = sadd.s32 4294967294, %s1063_s25  }
   0x7   : > { %1284 = sst [smem:[#allocation8_spill]] %s1059_s24  ;;  %s27_s28 = sadd.s32 1, %s1055_s23 }
   0x8   : > { %p28_p0 = scmp.ge.s32.totalorder %s27_s28, 4  ;;  %s30_s29 = sadd.s32 1, %s1059_s24 }
   0x9   : > { %p177_p1 = scmp.ne.s32.totalorder %s1043_s20, %s1039_s19  ;;  %p178_p2 = scmp.eq.s32.totalorder %s795_s26, 7 }
   0xa   : > { %s1302_s28 = smov (%p28_p0, %s27_s28), 0  ;;  %s1304_s29 = smov (!%p28_p0, %s30_s29), %s1059_s24 }
   0xb   : > { %1285 = sst [smem:[#allocation9_spill]] %s1302_s28  ;;  %p1148_p3 = por %p178_p2, %p177_p1 }
   0xc   : > { %p183_p4 = scmp.ne.s32.totalorder %s1039_s19, %s1035_s18  ;;  %p32_p5 = scmp.ge.s32.totalorder %s1304_s29, 2 }
   0xd   : > { %p184_p6 = scmp.eq.s32.totalorder %s796_s27, 7  ;;  %p799_p7 = scmp.ge.s32.totalorder %s1063_s25, 1 }
   0xe   : > { %p240_p8 = scmp.lt.s32.totalorder %s1063_s25, 9  ;;  %s1306_s29 = smov (%p32_p5, %s1304_s29), 0 }
   0xf   : > { %1287 = sst [smem:[#allocation10_spill]] %s1306_s29  ;;  %p1158_p9 = por %p184_p6, %p183_p4 }
  0x10   : > { %p241_p10 = pnand %p799_p7, %p240_p8  ;;  %s164_s7 = ssub.s32 %s1059_s24, %s1306_s29 }
  0x11   : > { %s1288_s6 = scalar_select %p1158_p9, 1, 0 }
  0x12   : > { %s167_s8 = sadd.s32 1, %s1043_s20  ;;  %p165_p11 = scmp.eq.s32.totalorder %s164_s7, 0 }
  0x13   : > { %1289 = sst [smem:[#allocation11_spill]] %s1288_s6  ;;  %244 = sbr.rel (%p241_p10) target bundleno = 1025 (0x401), region = 40 }
  0x14   : > { %s1166_s9 = scalar_select %p165_p11, %s1043_s20, %s167_s8  }
  0x15   : > { %s1278_s10 = sand.u32 (!%p241_p10), 1, %s1039_s19   ;;  %p286_p12 = scmp.lt.s32.totalorder (!%p241_p10), %s1051_s22, 1 }
  0x16   : > { %1290 = sst [smem:[#allocation12_spill]] %s1166_s9  ;;  %s1172_s11 = sshll.u32 (!%p241_p10), %s1278_s10, 2 }
  0x17   : > { %p290_p13 = scmp.lt.s32.totalorder (!%p241_p10), %s1047_s21, 3  ;;  %p809_p0 = scmp.ne.s32.totalorder (!%p241_p10), %s1047_s21, 0 }
  0x18   : > { %s287_s12 = scalar_select %p286_p12, %s1051_s22, 1 }
  0x19   : > { %s291_s13 = scalar_select %p290_p13, %s1047_s21, 3 }
  0x1a   : > { %s801_s14 = sshll.u32 %s287_s12, 2  ;;  %313 = sbr.rel (%p809_p0) target bundleno = 33 (0x21), region = 44 }
  0x1b   : > { %s289_s17 = scalar_lea.vmem %s1270_s0, %s801_s14  ;;  %s827_s26 = sshll.u32 %s291_s13, 4 }
  0x1c   : > { %s294_s8 = scalar_lea.vmem %s1271_s1, %s827_s26  ;;  %s299_s24 = scalar_lea.vmem %s1272_s2, %s827_s26 }
  0x1d   : > { %s1189_s9 = scalar_lea.vmem %s1273_s3, %s827_s26  ;;  %s808_s20 = sshll.u32 %s291_s13, 2 }
  0x1e   : > { %s1194_s15 = scalar_lea.vmem %s1274_s4, %s808_s20  ;;  %s285_s14 = scalar_lea.vmem [#allocation3], %s1172_s11 }
  0x1f   : > { %vm314_vm0 = vcmask 261120   ;;  %v1065_v0 = vmov 0.0  }
  0x20   : > { %315 = vst.msk [vmem:[#allocation2] sm:$0xff] %vm314_vm0, %v1065_v0 }
  0x21 PF: > { %v961_v1 = vld [vmem:[%s299_s24 + $0x8] sm:$0xff]   ;;  %v1066_v2 = vmov 0.0   ;;  %v963_v4 = vld [vmem:[%s299_s24] sm:$0xff]   ;;  %vm1067_vm1 = vmmov 0   ;;  %vm333_vm2 = vcmask 261120   ;;  %vm491_vm3 = vcmask 64512  }
  0x22   : > { %853 = vmatprep.subr.bf16.mxu1 %v1066_v2  ;;  %845 = vmatprep.subr.bf16.mxu0 %v1066_v2  ;;  %v962_v3 = vld [vmem:[%s294_s8 + $0x8] sm:$0xff]   ;;  %v964_v5 = vld [vmem:[%s294_s8] sm:$0xff]   ;;  %v538_v20 = vlaneseq  ;;  %vm558_vm5 = vcmask 1043456   ;;  %p822_p1 = scmp.ne.s32.totalorder %s1047_s21, 3 }
  0x23   : > { %854 = vmatpush3.bf16.msra.mxu1 %v961_v1  ;;  %857 = vmatprep.mubr.msk.bf16.mxu1 %vm1067_vm1, %v1066_v2  ;;  %v316_v6 = vld [vmem:[%s289_s17] sm:$0xf]  ;;  %v965_v7 = vld [vmem:[%s1189_s9 + $0x8] sm:$0xff]  }
  0x24   : > { %846 = vmatpush3.bf16.msra.mxu0 %v962_v3  ;;  %855 = vmatprep.subr.bf16.mxu1 %v1066_v2  ;;  %v966_v8 = vld [vmem:[%s1189_s9] sm:$0xff]   ;;  %v539_v21 = vshrl.u32 %v538_v20, 7  ;;  %v541_v22 = vand.u32 127, %v538_v20 }
  0x25   : > { %847 = vmatprep.subr.bf16.mxu0 %v1066_v2  ;;  %849 = vmatprep.mubr.msk.bf16.mxu0 %vm1067_vm1, %v1066_v2  ;;  %v606_v41 = vld [vmem:[%s1194_s15] sm:$0xf] }
  0x26   : > { %vm542_vm4 = vcmp.le.s32.totalorder %v541_v22, %v539_v21  ;;  %v611_v42 = vsel %vm558_vm5, %v606_v41, 0 }
  0x27   : > { %856 = vmatpush3.bf16.msra.mxu1 %v963_v4  ;;  %v604_v51 = vld [vmem:[#allocation2] sm:$0xff] }
  0x28   : > { %848 = vmatpush3.bf16.msra.mxu0 %v964_v5  ;;  %869 = vmatprep.subr.bf16.mxu1 %v1066_v2 }
  0x29   : > { %861 = vmatprep.subr.bf16.mxu0 %v1066_v2 }
  0x2a   : > { %858 = vmatmul.mubr.msk.bf16.vlgmr.msra.gmra.mxu1 %vm333_vm2, %v316_v6 }
  0x2b   : > { %850 = vmatmul.mubr.msk.bf16.vlgmr.msra.gmra.mxu0 %vm333_vm2, %v316_v6  ;;  %871 = vmatprep.mubr.msk.bf16.mxu1 %vm1067_vm1, %v1066_v2 }
  0x2c   : > { %865 = vmatprep.mubr.msk.bf16.mxu0 %vm1067_vm1, %v1066_v2  ;;  %862 = vmatpush3.bf16.msra.mxu0 %v965_v7 }
  0x2d   : > { %863 = vmatprep.subr.bf16.mxu0 %v1066_v2 }
  0x30   : > { %864 = vmatpush3.bf16.msra.mxu0 %v966_v8 }
  0x31   : > { %875 = vmatprep.subr.bf16.mxu0 %v1066_v2 }
  0x33   : > { %866 = vmatmul.mubr.msk.bf16.vlgmr.msra.gmra.mxu0 %vm333_vm2, %v316_v6 }
  0x34   : > { %877 = vmatprep.mubr.msk.bf16.mxu0 %vm1067_vm1, %v1066_v2 }
  0xea   : > { %v427_v9 = vpop.f32.mrf.mxu1 }
  0xeb   : > { %v490_v10 = vpack.c.bf16 %v427_v9, %v427_v9  ;;  %v371_v11 = vpop.f32.mrf.mxu0 }
  0xec   : > { %v859_v12 = vpop.f32.mrf.mxu1  ;;  %v489_v18 = vpack.c.bf16 %v371_v11, %v371_v11 }
  0xed   : > { %v496_v13 = vsel %vm491_vm3, %v490_v10, 0  ;;  %v851_v14 = vpop.f32.mrf.mxu0 }
  0xee   : > { %v430_v15 = vpop.f32.mrf.mxu1  ;;  %870 = vmatpush3.bf16.xpose.msra.mxu1 %v496_v13 }
  0xef   : > { %v374_v16 = vpop.f32.mrf.mxu0  ;;  %881 = vmatprep.subr.bf16.mxu1 %v1066_v2 }
  0xf0   : > { %v860_v17 = vpop.f32.mrf.mxu1 }
  0xf1   : > { %v852_v19 = vpop.f32.mrf.mxu0 }
  0xf3   : > { %v483_v29 = vpop.f32.mrf.mxu0 }
  0xf4   : > { %v554_v30 = vpack.c.bf16 %v483_v29, %v483_v29 }
  0xf5   : > { %872 = vmatmul.mubr.msk.bf16.vlgmr.msra.gmra.mxu1 %vm491_vm3, %v489_v18  ;;  %v867_v31 = vpop.f32.mrf.mxu0 }
  0xf6   : > { %883 = vmatprep.mubr.msk.bf16.mxu1 %vm1067_vm1, %v1066_v2  ;;  %v560_v32 = vsel %vm558_vm5, %v554_v30, 0  ;;  %882 = vmatpush3.bf16.msra.mxu1 %v611_v42 }
  0xf7   : > { %v486_v33 = vpop.f32.mrf.mxu0  ;;  %876 = vmatpush3.bf16.msra.mxu0 %v560_v32 }
  0xf9   : > { %v868_v34 = vpop.f32.mrf.mxu0 }
 0x1b5   : > { %v532_v23 = vpop.f32.mrf.mxu1 }
 0x1b6   : > { %v543_v24 = vsel %vm542_vm4, %v532_v23, -1e+30 }
 0x1b7   : > { %v873_v25 = vpop.f32.mrf.mxu1  ;;  %v544_v26 = vsel %vm491_vm3, %v543_v24, -inf }
 0x1b8   : > { %545 = vmax.xlane.f32.xlu0 %v544_v26 }
 0x1b9   : > { %v535_v27 = vpop.f32.mrf.mxu1 }
 0x1bb   : > { %v874_v28 = vpop.f32.mrf.mxu1 }
 0x241   : > { %v546_v35 = vpop.xlane.xlu0 %545 }
 0x242   : > { %v547_v36 = vsub.f32 %v543_v24, %v546_v35 }
 0x244   : > { %v548_v37 = vmul.f32 1.442695, %v547_v36 }
 0x246   : > { %967 = vpow2.f32 %v548_v37 }
 0x253   : > { %v968_v38 = vpop.eup %967 }
 0x254   : > { %v550_v39 = vsel %vm491_vm3, %v968_v38, 0.0  ;;  %v553_v40 = vpack.c.bf16 %v968_v38, %v968_v38 }
 0x255   : > { %551 = vadd.xlane.f32.xlu0 %v550_v39 }
 0x256   : > { %878 = vmatmul.mubr.msk.bf16.vlgmr.msra.gmra.mxu0 %vm491_vm3, %v553_v40 }
 0x2de   : > { %v552_v43 = vpop.xlane.xlu0 %551 }
 0x2df   : > { %969 = vrcp.f32 %v552_v43 }
 0x2ec   : > { %v970_v44 = vpop.eup %969 }
 0x316   : > { %v596_v45 = vpop.f32.mrf.mxu0 }
 0x317   : > { %v603_v46 = vmul.f32 %v970_v44, %v596_v45 }
 0x318   : > { %v879_v47 = vpop.f32.mrf.mxu0 }
 0x319   : > { %v605_v48 = vpack.c.bf16 %v603_v46, %v603_v46 }
 0x31a   : > { %v599_v49 = vpop.f32.mrf.mxu0 }
 0x31b   : > { %884 = vmatmul.mubr.msk.bf16.vlgmr.msra.gmra.mxu1 %vm491_vm3, %v605_v48 }
 0x31c   : > { %v880_v50 = vpop.f32.mrf.mxu0 }
 0x3db   : > { %v647_v52 = vpop.f32.mrf.mxu1 }
 0x3dc   : > { %v653_v53 = vadd.f32 %v647_v52, %v604_v51 }
 0x3dd   : > { %v885_v54 = vpop.f32.mrf.mxu1  ;;  %658 = sbr.rel (%p822_p1) target bundleno = 1001 (0x3e9), region = 48 }
 0x3de   : > { %654 = vst.msk [vmem:[#allocation2] sm:$0xff] %vm333_vm2, %v653_v53 }
 0x3df   : > { %v650_v55 = vpop.f32.mrf.mxu1 }
 0x3e1   : > { %v886_v56 = vpop.f32.mrf.mxu1 }
 0x3e2   : > { %vm661_vm6 = vcmask 257024  }
 0x3e5   : > { %v659_v57 = vld [vmem:[#allocation2] sm:$0xff] }
 0x3e6   : > { %v660_v58 = vpack.c.bf16 %v659_v57, %v659_v57 }
 0x3e8   : > { %662 = vst.msk [vmem:[%s285_s14] sm:$0xf] %vm661_vm6, %v660_v58 }
 0x3e9 PF: > { %s824_s20 = sshll.u32 %s1051_s22, 6  ;;  %s677_s29 = sshll.u32 %s285_s14, 4  ;;  %s678_s29 = int_to_ptr.vmem [resolvable:$true] %s677_s29 }
 0x3ea   : > { %s675_s28 = scalar_lea.hbm %s1275_s5, %s824_s20  ;;  %s1291_s21 = sand.u32 1, %s1039_s19  }
 0x3eb   : > { %s664_s6 = scalar_lea.sflag [#allocation4], %s1291_s21  ;;  %s971_s9 = scalar_lea.vmem %s678_s29, 64 }
 0x3ec   : > { %p972_p2 = scmp.ne.s32.totalorder %s678_s29, %s971_s9  ;;  %s1068_s10 = smov [#allocation3]  }
 0x3ed   : > { %s975_s13 = sshll.u32 %s1068_s10, 4  ;;  %s976_s13 = int_to_ptr.vmem [resolvable:$false] %s975_s13 }
 0x3ee   : > { %p973_p4 = pnand %p972_p2, %p1148_p3  ;;  %s977_s16 = scalar_lea.vmem %s976_s13, 128 }
 0x3ef   : > { %p978_p6 = scmp.lt.s32.totalorder %s678_s29, %s976_s13  ;;  %p979_p7 = scmp.lt.s32.totalorder %s977_s16, %s971_s9 }
 0x3f0   : > { %p974_p5 = pneg %p973_p4 }
 0x3f1   : > { %p980_p8 = por %p979_p7, %p978_p6 }
 0x3f3   : > { %p981_p10 = pnand %p980_p8, %p974_p5 }
 0x3f5   : > { %984 = shalt.err (!%p981_p10)
}
 0x3f6   : > { %s985_s22 = scalar_lea.hbm %s675_s28, 64  ;;  %s989_s26 = scalar_lea.hbm %s1275_s5, 128 }
 0x3f7   : > { %p986_p11 = scmp.ne.s32.totalorder %s675_s28, %s985_s22  ;;  %p990_p0 = scmp.lt.s32.totalorder %s675_s28, %s1275_s5 }
 0x3f8   : > { %p991_p1 = scmp.lt.s32.totalorder %s989_s26, %s985_s22 }
 0x3f9   : > { %p987_p12 = pnand %p986_p11, %p1148_p3 }
 0x3fa   : > { %p992_p2 = por %p991_p1, %p990_p0 }
 0x3fb   : > { %p988_p13 = pneg %p987_p12 }
 0x3fd   : > { %p993_p4 = pnand %p992_p2, %p988_p13 }
 0x3ff   : > { %996 = shalt.err (!%p993_p4)
}
 0x400   : > { %887 = dma.vmem_to_hbm [thread:$0]  (%p1148_p3), %s678_s29, 64, %s675_s28, %s664_s6  }
 0x401 PF: > { %p893_p5 = scmp.ge.s32.totalorder %s1063_s25, 2  ;;  %s689_s12 = sand.u32 1, %s1035_s18  }
 0x402   : > { %s690_s15 = scalar_lea.sflag [#allocation4], %s689_s12 }
 0x403   : > { %p890_p6 = pnand %p893_p5, %p1158_p9 }
 0x405   : > { %p891_p7 = pneg %p890_p6 }
 0x407   : > { %1030 = dma.done.wait (%p891_p7), %s690_s15, 64  }
 0x408   : > { %1032 = vsyncadd (%p891_p7), %s690_s15, 4294967232  ;;  %s18_s25 = sadd.s32 1, %s1063_s25   ;;  %s1293_s14 = sld [smem:[#allocation6_spill]] }
 0x409   : > { %p15_p8 = scmp.ge.s32.totalorder %s18_s25, 10   ;;  %s1294_s20 = sld [smem:[#allocation12_spill]] }
 0x40a   : > { %s1295_s21 = sld [smem:[#allocation7_spill]]  ;;  %s1299_s18 = smov %s1039_s19 }
 0x40b   : > { %s1296_s22 = sld [smem:[#allocation8_spill]]  ;;  %17 = sbr.rel (!%p15_p8) target bundleno = 5 (0x5), region = 95 }
 0x40c   : > { %s1297_s23 = sld [smem:[#allocation9_spill]] }
 0x40d   : > { %s1298_s24 = sld [smem:[#allocation10_spill]] }
 0x40e   : > { %s1300_s19 = smov %s1293_s14 }
 0x410   :  { %695 = vsyncpa [#allocation4], 1 }
 0x411   :  { %697 = vsyncpa [#allocation4 + $0x1], 1 }

</bundles_post_ra>
